<compile_context>
chip_gen: v6e
topology: v6e:2x2x1
jax: 0.10.0
libtpu: 0.0.40
codegen_flags: <defaults>
</compile_context>

<pallas_src>
import functools

import jax
import jax.numpy as jnp
from jax.experimental import pallas as pl
from jax.experimental.pallas import tpu as pltpu


def _knn_focal_loss_kernel(logits_ref, knn_ref, targets_ref, gamma_ref, out_ref,
                           *, n_rows, tile_n):
    logits = logits_ref[...].astype(jnp.float32)      # (T, C)
    knn = knn_ref[...].astype(jnp.float32)            # (T, C)
    tgt = targets_ref[...]                            # (T, 1) int32
    gamma = gamma_ref[0, 0]                           # f32 scalar (SMEM)

    t, c = logits.shape

    # one-hot mask of the target class per row
    class_ids = jax.lax.broadcasted_iota(jnp.int32, (t, c), 1)
    onehot = class_ids == tgt                         # (T, C) bool

    # per-sample cross entropy: logsumexp(logits) - logits[target]
    m = jnp.max(logits, axis=-1, keepdims=True)                                 # (T, 1)
    lse = jnp.log(jnp.sum(jnp.exp(logits - m), axis=-1, keepdims=True)) + m     # (T, 1)
    logit_t = jnp.sum(jnp.where(onehot, logits, 0.0), axis=-1, keepdims=True)   # (T, 1)
    ce = lse - logit_t                                                          # (T, 1)

    # focal-like modulator (1 - p_t)**gamma.
    # 1 - p_t = (sum of non-target knn mass) / (total knn mass): no cancellation.
    knn_sum = jnp.sum(knn, axis=-1, keepdims=True)                              # (T, 1)
    knn_rest = jnp.sum(jnp.where(onehot, 0.0, knn), axis=-1, keepdims=True)     # (T, 1)
    one_minus_pt = knn_rest * pl.reciprocal(knn_sum, approx=False)              # (T, 1)
    modulator = jnp.exp(gamma * jnp.log(one_minus_pt))                          # (T, 1)

    loss = ce * modulator                                                       # (T, 1)

    # zero rows past the logical batch size (ragged last tile); the out-of-bounds
    # part of the block is clipped on writeback anyway, this is belt-and-braces.
    row_ids = (jax.lax.broadcasted_iota(jnp.int32, (t, 1), 0)
               + pl.program_id(0) * tile_n)
    out_ref[...] = jnp.where(row_ids < n_rows, loss, 0.0)


def _pick_tile_n(n, c, itemsize):
    """Rows per tile: keep 2 streamed inputs x 2 pipeline buffers under ~12 MiB so
    the kernel fits v5e's 16 MiB default scoped VMEM and v7x's smaller VMEM."""
    budget = 12 * 1024 * 1024
    per_row = 4 * c * itemsize            # 2 inputs x 2 pipeline buffers
    cap = max(8, budget // max(per_row, 1))
    tile = min(n, 1024, cap)
    if tile >= n:
        return n                          # full-dim block: always layout-legal
    return max(8, (tile // 8) * 8)        # keep sublane (8) alignment


def knn_focal_like_loss(pred_logits, knn_logits, targets, coeff, *, tile_n=None):
    """JAX wrapper reproducing knnFocalLikeLoss.forward."""
    n, c = pred_logits.shape
    targets_2d = targets.astype(jnp.int32).reshape(n, 1)
    gamma = jnp.asarray(coeff, dtype=jnp.float32).reshape(1, 1)

    itemsize = max(jnp.dtype(pred_logits.dtype).itemsize,
                   jnp.dtype(knn_logits.dtype).itemsize)
    if tile_n is None:
        tile_n = _pick_tile_n(n, c, itemsize)
    tile_n = int(min(tile_n, n))
    num_tiles = pl.cdiv(n, tile_n)

    # 2 streamed inputs + targets + per-row output, double-buffered, plus slack.
    vmem_needed = 4 * tile_n * c * itemsize + 16 * tile_n + (2 << 20)
    vmem_limit = int(min(96 * 1024 * 1024, max(32 * 1024 * 1024, vmem_needed)))

    kernel = functools.partial(_knn_focal_loss_kernel, n_rows=n, tile_n=tile_n)

    per_row_loss = pl.pallas_call(
        kernel,
        out_shape=jax.ShapeDtypeStruct((n, 1), jnp.float32),
        grid=(num_tiles,),
        in_specs=[
            pl.BlockSpec((tile_n, c), lambda i: (i, 0)),             # logits (native dtype)
            pl.BlockSpec((tile_n, c), lambda i: (i, 0)),             # knn_logits
            pl.BlockSpec((tile_n, 1), lambda i: (i, 0)),             # targets (N, 1) int32
            pl.BlockSpec(memory_space=pltpu.MemorySpace.SMEM),       # gamma (1, 1) f32
        ],
        out_specs=pl.BlockSpec((tile_n, 1), lambda i: (i, 0)),       # per-row loss
        compiler_params=pltpu.CompilerParams(
            dimension_semantics=("parallel",),
            vmem_limit_bytes=vmem_limit,
        ),
    )(pred_logits, knn_logits, targets_2d, gamma)

    # Tiny final reduction (N floats) done in plain JAX.
    return jnp.sum(per_row_loss) / jnp.float32(n)


def _reference(pred_logits, knn_logits, targets, coeff):
    """Pure-JAX reference for correctness checking."""
    logp = jax.nn.log_softmax(pred_logits.astype(jnp.float32), axis=-1)
    ce = -jnp.take_along_axis(logp, targets[:, None], axis=-1)[:, 0]
    p = knn_logits.astype(jnp.float32)
    p = p / jnp.sum(p, axis=-1, keepdims=True)
    p_t = jnp.take_along_axis(p, targets[:, None], axis=-1)[:, 0]
    mod = jnp.exp(coeff * jnp.log1p(-p_t))
    return jnp.sum(ce * mod) / pred_logits.shape[0]


if __name__ == "__main__":
    key = jax.random.PRNGKey(0)
    k1, k2, k3 = jax.random.split(key, 3)

    # case 1: small single-tile case (batch=8, classes=32), f32 inputs
    N, C = 8, 32
    pred_logits = jax.random.normal(k1, (N, C), dtype=jnp.float32)
    # knn_logits must be positive so p is a valid distribution and p_t < 1
    knn_logits = jax.random.uniform(k2, (N, C), dtype=jnp.float32,
                                    minval=0.1, maxval=1.0)
    targets = jax.random.randint(k3, (N,), 0, C, dtype=jnp.int32)
    coeff = 2.0

    loss = knn_focal_like_loss(pred_logits, knn_logits, targets, coeff)
    jax.block_until_ready(loss)
    ref = _reference(pred_logits, knn_logits, targets, coeff)
    assert jnp.allclose(loss, ref, rtol=1e-5, atol=1e-5), (loss, ref)

    # case 2: multi-tile grid with a ragged last tile + native-bf16 streaming
    N2, C2 = 200, 64
    k4, k5, k6 = jax.random.split(jax.random.PRNGKey(1), 3)
    pred2 = jax.random.normal(k4, (N2, C2), dtype=jnp.bfloat16)
    knn2 = jax.random.uniform(k5, (N2, C2), dtype=jnp.float32,
                              minval=0.1, maxval=1.0)
    tgt2 = jax.random.randint(k6, (N2,), 0, C2, dtype=jnp.int32)
    loss2 = knn_focal_like_loss(pred2, knn2, tgt2, 1.5, tile_n=64)
    jax.block_until_ready(loss2)
    ref2 = _reference(pred2, knn2, tgt2, 1.5)
    assert jnp.allclose(loss2, ref2, rtol=1e-4, atol=1e-4), (loss2, ref2)

    print("KERNEL_OK")
</pallas_src>

<mosaic_0001>
module attributes {stable_mosaic.version = 11 : i64} {
  func.func @_knn_focal_loss_kernel(%arg0: i32, %arg1: memref<8x32xf32, #tpu.memory_space<vmem>>, %arg2: memref<8x32xf32, #tpu.memory_space<vmem>>, %arg3: memref<8x1xi32, #tpu.memory_space<vmem>>, %arg4: memref<1x1xf32, #tpu.memory_space<smem>>, %arg5: memref<8x1xf32, #tpu.memory_space<vmem>>) attributes {dimension_semantics = [#tpu.dimension_semantics<parallel>], iteration_bounds = array<i64: 1>, scalar_prefetch = 0 : i64, scratch_operands = 0 : i64, tpu.core_type = #tpu.core_type<tc>, window_params = [{transform_indices = @transform_0, window_bounds = array<i64: 8, 32>}, {transform_indices = @transform_1, window_bounds = array<i64: 8, 32>}, {transform_indices = @transform_2, window_bounds = array<i64: 8, 1>}, {transform_indices = @transform_3, window_bounds = array<i64: 1, 1>}, {transform_indices = @transform_4, window_bounds = array<i64: 8, 1>}]} {
    %c0 = arith.constant 0 : index
    %c0_0 = arith.constant 0 : index
    %0 = vector.load %arg1[%c0, %c0_0] : memref<8x32xf32, #tpu.memory_space<vmem>>, vector<8x32xf32>
    %c0_1 = arith.constant 0 : index
    %c0_2 = arith.constant 0 : index
    %1 = vector.load %arg2[%c0_1, %c0_2] : memref<8x32xf32, #tpu.memory_space<vmem>>, vector<8x32xf32>
    %c0_3 = arith.constant 0 : index
    %c0_4 = arith.constant 0 : index
    %2 = vector.load %arg3[%c0_3, %c0_4] : memref<8x1xi32, #tpu.memory_space<vmem>>, vector<8x1xi32>
    %c0_5 = arith.constant 0 : index
    %c0_6 = arith.constant 0 : index
    %3 = memref.load %arg4[%c0_5, %c0_6] : memref<1x1xf32, #tpu.memory_space<smem>>
    %4 = tpu.iota {dimensions = array<i32: 1>} : vector<8x32xi32>
    %5 = vector.broadcast %2 : vector<8x1xi32> to vector<8x32xi32>
    %6 = arith.cmpi eq, %4, %5 : vector<8x32xi32>
    %cst = arith.constant dense<0xFF800000> : vector<8xf32>
    %7 = vector.multi_reduction <maximumf>, %0, %cst [1] : vector<8x32xf32> to vector<8xf32>
    %8 = vector.shape_cast %7 : vector<8xf32> to vector<8x1xf32>
    %9 = vector.broadcast %8 : vector<8x1xf32> to vector<8x32xf32>
    %10 = arith.subf %0, %9 : vector<8x32xf32>
    %11 = math.exp %10 : vector<8x32xf32>
    %cst_7 = arith.constant dense<0.000000e+00> : vector<8xf32>
    %12 = vector.multi_reduction <add>, %11, %cst_7 [1] : vector<8x32xf32> to vector<8xf32>
    %13 = vector.shape_cast %12 : vector<8xf32> to vector<8x1xf32>
    %14 = math.log %13 : vector<8x1xf32>
    %15 = arith.addf %14, %8 : vector<8x1xf32>
    %cst_8 = arith.constant 0.000000e+00 : f32
    %16 = vector.broadcast %cst_8 : f32 to vector<8x32xf32>
    %17 = arith.select %6, %0, %16 : vector<8x32xi1>, vector<8x32xf32>
    %cst_9 = arith.constant dense<0.000000e+00> : vector<8xf32>
    %18 = vector.multi_reduction <add>, %17, %cst_9 [1] : vector<8x32xf32> to vector<8xf32>
    %19 = vector.shape_cast %18 : vector<8xf32> to vector<8x1xf32>
    %20 = arith.subf %15, %19 : vector<8x1xf32>
    %cst_10 = arith.constant dense<0.000000e+00> : vector<8xf32>
    %21 = vector.multi_reduction <add>, %1, %cst_10 [1] : vector<8x32xf32> to vector<8xf32>
    %22 = vector.shape_cast %21 : vector<8xf32> to vector<8x1xf32>
    %cst_11 = arith.constant 0.000000e+00 : f32
    %23 = vector.broadcast %cst_11 : f32 to vector<8x32xf32>
    %24 = arith.select %6, %23, %1 : vector<8x32xi1>, vector<8x32xf32>
    %cst_12 = arith.constant dense<0.000000e+00> : vector<8xf32>
    %25 = vector.multi_reduction <add>, %24, %cst_12 [1] : vector<8x32xf32> to vector<8xf32>
    %26 = vector.shape_cast %25 : vector<8xf32> to vector<8x1xf32>
    %27 = tpu.reciprocal %22 : vector<8x1xf32> -> vector<8x1xf32>
    %28 = arith.mulf %26, %27 : vector<8x1xf32>
    %29 = math.log %28 : vector<8x1xf32>
    %30 = vector.broadcast %3 : f32 to vector<8x1xf32>
    %31 = arith.mulf %30, %29 : vector<8x1xf32>
    %32 = math.exp %31 : vector<8x1xf32>
    %33 = arith.mulf %20, %32 : vector<8x1xf32>
    %34 = tpu.iota {dimensions = array<i32: 0>} : vector<8x1xi32>
    %c8_i32 = arith.constant 8 : i32
    %35 = arith.muli %arg0, %c8_i32 : i32
    %36 = vector.broadcast %35 : i32 to vector<8x1xi32>
    %37 = arith.addi %34, %36 : vector<8x1xi32>
    %c8_i32_13 = arith.constant 8 : i32
    %38 = vector.broadcast %c8_i32_13 : i32 to vector<8x1xi32>
    %39 = arith.cmpi slt, %37, %38 : vector<8x1xi32>
    %cst_14 = arith.constant 0.000000e+00 : f32
    %40 = vector.broadcast %cst_14 : f32 to vector<8x1xf32>
    %41 = arith.select %39, %33, %40 : vector<8x1xi1>, vector<8x1xf32>
    %c0_15 = arith.constant 0 : index
    %c0_16 = arith.constant 0 : index
    %42 = vector.load %arg5[%c0_15, %c0_16] : memref<8x1xf32, #tpu.memory_space<vmem>>, vector<8x1xf32>
    tpu.vector_store %arg5[%c0_15, %c0_16], %41 {strides = array<i32>} : memref<8x1xf32, #tpu.memory_space<vmem>>, vector<8x1xf32>,
    return
  }
  func.func @transform_0(%arg0: i32) -> (i32, i32) {
    %c0_i32 = arith.constant 0 : i32
    %c0_i32_0 = arith.constant 0 : i32
    return %arg0, %c0_i32 : i32, i32
  }
  func.func @transform_1(%arg0: i32) -> (i32, i32) {
    %c0_i32 = arith.constant 0 : i32
    %c0_i32_0 = arith.constant 0 : i32
    return %arg0, %c0_i32 : i32, i32
  }
  func.func @transform_2(%arg0: i32) -> (i32, i32) {
    %c0_i32 = arith.constant 0 : i32
    %c0_i32_0 = arith.constant 0 : i32
    return %arg0, %c0_i32 : i32, i32
  }
  func.func @transform_3(%arg0: i32) -> (i32, i32) {
    %c0_i32 = arith.constant 0 : i32
    %c0_i32_0 = arith.constant 0 : i32
    %c0_i32_1 = arith.constant 0 : i32
    return %c0_i32, %c0_i32_0 : i32, i32
  }
  func.func @transform_4(%arg0: i32) -> (i32, i32) {
    %c0_i32 = arith.constant 0 : i32
    %c0_i32_0 = arith.constant 0 : i32
    return %arg0, %c0_i32 : i32, i32
  }
}

</mosaic_0001>

<bundles_post_ra>
// kernel: tpu_custom_call.1
= control target key start
LH: loop header
LB: loop body
LE: loop exit
PB: predicated region body
PF: predicated region fallthrough
CT: control target
= control target key end

     0   :  { %10 = vsyncpa [#allocation4], 0  ;;  %s123_s15 = smov [#allocation3]   ;;  %s170_s0 = inlined_call_operand.vmem [shape: f32[8,32], index: 0, kind: input, shape index: {}]   ;;  %s171_s1 = inlined_call_operand.hbm [shape: f32[8,32], index: 1, kind: input, shape index: {}]   ;;  %s172_s2 = inlined_call_operand.vmem [shape: s32[8,1], index: 2, kind: input, shape index: {}]   ;;  %s173_s3 = inlined_call_operand.<no memory space> [shape: f32[1,1], index: 3, kind: input, shape index: {}]   ;;  %s174_s4 = inlined_call_operand.vmem [shape: f32[8,1], index: 4, kind: output, shape index: {}]  }
   0x1   :  { %s19_s16 = sshll.u32 %s123_s15, 4  ;;  %s20_s16 = int_to_ptr.vmem [resolvable:$true] %s19_s16 }
   0x2   :  { %s109_s17 = scalar_lea.vmem %s20_s16, 128  ;;  %p114_p1 = scmp.lt.s32.totalorder %s20_s16, %s20_s16 }
   0x3   :  { %p110_p0 = scmp.ne.s32.totalorder %s20_s16, %s109_s17  ;;  %p115_p2 = scmp.lt.s32.totalorder %s109_s17, %s109_s17 }
   0x5   :  { %p116_p3 = por %p115_p2, %p114_p1 }
   0x7   :  { %p117_p4 = pnand %p116_p3, %p110_p0 }
   0x9   :  { %120 = shalt.err (!%p117_p4)
}
   0xa   :  { %22 = dma.hbm_to_vmem [thread:$0]  %s171_s1, 128, %s20_s16, [#allocation4]  }
   0xb   :  { %121 = dma.done.wait [#allocation4], 128  }
   0xc   :  { %122 = vsyncadd [#allocation4], 4294967168  ;;  %v124_v0 = vmov 0   ;;  %vm40_vm0 = vcmask 261120   ;;  %v30_v1 = vld [vmem:[%s170_s0] sm:$0xff]  ;;  %v34_v8 = vlaneseq  ;;  %v69_v24 = vstv %s173_s3 }
   0xd   :  { %90 = vset.pattern.permute.xlu0 %v124_v0  ;;  %v31_v2 = vld [vmem:[#allocation3] sm:$0xff]  ;;  %v41_v3 = vsel %vm40_vm0, %v30_v1, -inf  ;;  %vm81_vm2 = vcmask 7168  }
   0xe   :  { %v58_v4 = vsel %vm40_vm0, %v31_v2, 0.0  ;;  %42 = vmax.xlane.f32.xlu0 %v41_v3  ;;  %v32_v5 = vld [vmem:[%s172_s2] sm:$0xff]  ;;  %v35_v10 = vand.u32 127, %v34_v8 }
   0xf   :  { %59 = vadd.xlane.f32.xlu1 %v58_v4 }
  0x24   :  { %37 = vperm.xlu0 %90, %v32_v5  }
  0x97   :  { %v43_v6 = vpop.xlane.xlu0 %42 }
  0x98   :  { %v44_v7 = vsub.f32 %v30_v1, %v43_v6  ;;  %v60_v18 = vpop.xlane.xlu1 %59 }
  0x9a   :  { %v45_v9 = vmul.f32 1.442695, %v44_v7 }
  0x9c   :  { %91 = vpow2.f32 %v45_v9 }
  0x9d   :  { %93 = vrcp.f32 %v60_v18 }
  0x9f   :  { %v38_v11 = vpop.permute.xlu0 %37 }
  0xa0   :  { %vm39_vm1 = vcmp.eq.s32.totalorder %v35_v10, %v38_v11 }
  0xa1   :  { %v61_v12 = vsel %vm39_vm1, 0.0, %v31_v2  ;;  %v53_v16 = vsel %vm39_vm1, %v30_v1, 0.0 }
  0xa2   :  { %v62_v13 = vsel %vm40_vm0, %v61_v12, 0.0  ;;  %v54_v17 = vsel %vm40_vm0, %v53_v16, 0.0 }
  0xa3   :  { %63 = vadd.xlane.f32.xlu1 %v62_v13 }
  0xa9   :  { %v92_v14 = vpop.eup %91 }
  0xaa   :  { %v47_v15 = vsel %vm40_vm0, %v92_v14, 0.0  ;;  %v94_v19 = vpop.eup %93 }
  0xab   :  { %48 = vadd.xlane.f32.xlu1 %v47_v15 }
  0xaf   :  { %55 = vadd.xlane.f32.xlu1 %v54_v17 }
 0x12c   :  { %v64_v20 = vpop.xlane.xlu1 %63 }
 0x12d   :  { %v66_v21 = vmul.f32 %v94_v19, %v64_v20 }
 0x12f   :  { %95 = vlog2.f32 %v66_v21 }
 0x134   :  { %v49_v22 = vpop.xlane.xlu1 %48 }
 0x135   :  { %97 = vlog2.f32 %v49_v22 }
 0x138   :  { %v56_v31 = vpop.xlane.xlu1 %55 }
 0x13c   :  { %v96_v23 = vpop.eup %95 }
 0x13d   :  { %v68_v25 = vmul.f32 0.6931472, %v96_v23 }
 0x13f   :  { %v70_v26 = vmul.f32 %v69_v24, %v68_v25 }
 0x141   :  { %v71_v27 = vmul.f32 1.442695, %v70_v26 }
 0x142   :  { %v98_v28 = vpop.eup %97 }
 0x143   :  { %99 = vpow2.f32 %v71_v27  ;;  %v51_v29 = vmul.f32 0.6931472, %v98_v28 }
 0x145   :  { %v52_v30 = vadd.f32 %v51_v29, %v43_v6 }
 0x147   :  { %v57_v32 = vsub.f32 %v52_v30, %v56_v31 }
 0x150   :  { %v100_v33 = vpop.eup %99 }
 0x151   :  { %v73_v34 = vmul.f32 %v100_v33, %v57_v32 }
 0x153   :  { %82 = vst.msk [vmem:[%s174_s4] sm:$0xff] %vm81_vm2, %v73_v34 }
 0x154   :  { %87 = vsyncpa [#allocation4], 1 }

</bundles_post_ra>
